<compile_context>
chip_gen: v7x
topology: tpu7x:2x2x1
jax: 0.10.0
libtpu: 0.0.40
codegen_flags: <defaults>
</compile_context>

<pallas_src>
import functools

import numpy as np
import jax
import jax.numpy as jnp
from jax.experimental import pallas as pl
from jax.experimental.pallas import tpu as pltpu


def _round_up(x, m):
    return ((x + m - 1) // m) * m


def _supervised_partials_kernel(kp_ref, w_ref, par_ref, pmask_ref, out_ref,
                                *, NBPAD, P3PAD, NEPAD):
    """Per-batch-block partial sums.

    kp_ref   : (10, TB, KPAD)  [p2x,p2y,p3cx,p3cy,p3cz, g2x,g2y,g3cx,g3cy,g3cz]
               (3D joints already pelvis-centered in the wrapper)
    w_ref    : (3, TB, KPAD)   [w2, w3, aux(lane0=cur, lane1=own)]
    par_ref  : (2, TB, NPPAD)  [pred | gt], betas|pose|exp 128-lane aligned
    pmask_ref: (3, KPAD)       rows [face, body, hand] keypoint masks
    out_ref  : (1, 8, 128)     lanes 0..9 = [face_s, body_s, hand_s, body3d_s,
                               b_cur, b_own, p_cur, p_own, e_cur, e_own]
    """
    f32 = jnp.float32

    # ---- 2D keypoint weighted L1: per-keypoint column sums, then 3 part sums.
    w2 = w_ref[0].astype(f32)                                       # (TB, KPAD)
    a2 = (jnp.abs(kp_ref[0].astype(f32) - kp_ref[5].astype(f32)) +
          jnp.abs(kp_ref[1].astype(f32) - kp_ref[6].astype(f32))) * w2
    s2 = jnp.sum(a2, axis=0, keepdims=True)                         # (1, KPAD)
    pm = pmask_ref[...].astype(f32)                                 # (3, KPAD)
    face_s = jnp.sum(s2 * pm[0:1, :])
    body_s = jnp.sum(s2 * pm[1:2, :])
    hand_s = jnp.sum(s2 * pm[2:3, :])

    # ---- 3D keypoint weighted L1 (inputs pre-centered, planar x|y|z blocks).
    w3 = w_ref[1].astype(f32)
    a3 = (jnp.abs(kp_ref[2].astype(f32) - kp_ref[7].astype(f32)) +
          jnp.abs(kp_ref[3].astype(f32) - kp_ref[8].astype(f32)) +
          jnp.abs(kp_ref[4].astype(f32) - kp_ref[9].astype(f32))) * w3
    body3d_s = jnp.sum(a3)

    # ---- SMPL-X parameter squared-error row sums, weighted by cur/own flags.
    dq = par_ref[0].astype(f32) - par_ref[1].astype(f32)            # (TB, NPPAD)
    sq = dq * dq
    betas_r = jnp.sum(sq[:, :NBPAD], axis=1, keepdims=True)         # (TB, 1)
    pose_r = jnp.sum(sq[:, NBPAD:NBPAD + P3PAD], axis=1, keepdims=True)
    exp_r = jnp.sum(sq[:, NBPAD + P3PAD:NBPAD + P3PAD + NEPAD], axis=1,
                    keepdims=True)
    cur = w_ref[2, :, 0:1].astype(f32)                               # (TB, 1)
    own = w_ref[2, :, 1:2].astype(f32)
    b_cur = jnp.sum(betas_r * cur)
    b_own = jnp.sum(betas_r * own)
    p_cur = jnp.sum(pose_r * cur)
    p_own = jnp.sum(pose_r * own)
    e_cur = jnp.sum(exp_r * cur)
    e_own = jnp.sum(exp_r * own)

    # ---- pack the 10 partial sums into a lane-dense output tile.
    lane = jax.lax.broadcasted_iota(jnp.int32, (8, 128), 1)
    acc = jnp.zeros((8, 128), f32)
    for idx, v in enumerate((face_s, body_s, hand_s, body3d_s,
                             b_cur, b_own, p_cur, p_own, e_cur, e_own)):
        acc = jnp.where(lane == idx, v, acc)
    out_ref[0] = acc


def supervised_forward(pred2d, gt2d_full, conf, pred3d, gt3d, j3d_full,
                       dset_masks, part_masks,
                       betas_p, betas_g, pose_p, pose_g, exp_p, exp_g,
                       left_hip_idx, right_hip_idx, *,
                       block_b=512, pack_dtype=jnp.float32):
    """Returns the scalar `is_body=True` loss of Supervised.forward.

    pack_dtype: use jnp.bfloat16 on v6e/v7x to halve HBM traffic / VMEM
    footprint (accumulation stays f32 in the kernel); keep f32 on v5e.
    """
    B, K = conf.shape
    NB = betas_p.shape[1]
    P3 = pose_p.shape[1]
    NE = exp_p.shape[1]

    KPAD = _round_up(K, 128)
    NBPAD = _round_up(NB, 128)
    P3PAD = _round_up(P3, 128)
    NEPAD = _round_up(NE, 128)
    NPPAD = NBPAD + P3PAD + NEPAD

    TB = max(8, min(_round_up(block_b, 8), _round_up(B, 8)))
    B_pad = _round_up(B, TB)
    nblk = B_pad // TB

    f32 = jnp.float32
    conf = conf.astype(f32)
    dset_masks = dset_masks.astype(f32)
    member = jnp.sum(dset_masks, axis=1, keepdims=True)              # (B, 1)
    # Exact compare matches the PyTorch `weights[weights == -1] = 0`.
    w2 = jnp.where(conf == -1.0, 0.0, conf) * member                 # (B, K)
    w3 = conf * member                                               # raw conf, as in PyTorch

    # h36m GT-3D override + pelvis centering, fused into the packing pass.
    gt3d_m = jnp.where(dset_masks[:, 0][:, None, None] > 0.0,
                       j3d_full[:, :, :3], gt3d)
    hips = jnp.array([left_hip_idx, right_hip_idx])
    pred3c = pred3d - jnp.mean(pred3d[:, hips, :], axis=1, keepdims=True)
    gt3c = gt3d_m - jnp.mean(gt3d_m[:, hips, :], axis=1, keepdims=True)
    gt2d = gt2d_full[:, :, :-1]

    # coordinate-major, lane-padded keypoint slab: (10, B_pad, KPAD)
    kp = jnp.stack([pred2d[:, :, 0], pred2d[:, :, 1],
                    pred3c[:, :, 0], pred3c[:, :, 1], pred3c[:, :, 2],
                    gt2d[:, :, 0], gt2d[:, :, 1],
                    gt3c[:, :, 0], gt3c[:, :, 1], gt3c[:, :, 2]], axis=0)
    kp = jnp.pad(kp.astype(f32), ((0, 0), (0, B_pad - B), (0, KPAD - K)))

    # weight slab (3, B_pad, KPAD): [w2, w3, aux(lane0=cur, lane1=own)]
    aux = jnp.zeros((B, KPAD), f32)
    aux = aux.at[:, 0].set(dset_masks[:, 1]).at[:, 1].set(dset_masks[:, 2])
    w = jnp.stack([jnp.pad(w2, ((0, 0), (0, KPAD - K))),
                   jnp.pad(w3, ((0, 0), (0, KPAD - K))),
                   aux], axis=0)
    w = jnp.pad(w, ((0, 0), (0, B_pad - B), (0, 0)))

    # parameter slab (2, B_pad, NPPAD): betas|pose|exp, each 128-lane aligned.
    def pack_par(b, p, e):
        return jnp.concatenate(
            [jnp.pad(b.astype(f32), ((0, 0), (0, NBPAD - NB))),
             jnp.pad(p.astype(f32), ((0, 0), (0, P3PAD - P3))),
             jnp.pad(e.astype(f32), ((0, 0), (0, NEPAD - NE)))], axis=1)
    par = jnp.stack([pack_par(betas_p, pose_p, exp_p),
                     pack_par(betas_g, pose_g, exp_g)], axis=0)
    par = jnp.pad(par, ((0, 0), (0, B_pad - B), (0, 0)))

    pmask = jnp.pad(part_masks.astype(f32), ((0, 0), (0, KPAD - K)))

    kp = kp.astype(pack_dtype)
    w = w.astype(pack_dtype)
    par = par.astype(pack_dtype)
    pmask = pmask.astype(pack_dtype)

    itemsize = jnp.dtype(pack_dtype).itemsize
    blk_bytes = itemsize * TB * (13 * KPAD + 2 * NPPAD)
    vmem_limit = int(min(64 << 20, max(32 << 20, 3 * blk_bytes)))

    kernel = functools.partial(_supervised_partials_kernel,
                               NBPAD=NBPAD, P3PAD=P3PAD, NEPAD=NEPAD)
    partials = pl.pallas_call(
        kernel,
        out_shape=jax.ShapeDtypeStruct((nblk, 8, 128), jnp.float32),
        grid=(nblk,),
        in_specs=[
            pl.BlockSpec((10, TB, KPAD), lambda i: (0, i, 0)),
            pl.BlockSpec((3, TB, KPAD), lambda i: (0, i, 0)),
            pl.BlockSpec((2, TB, NPPAD), lambda i: (0, i, 0)),
            pl.BlockSpec((3, KPAD), lambda i: (0, 0)),
        ],
        out_specs=pl.BlockSpec((1, 8, 128), lambda i: (i, 0, 0)),
        compiler_params=pltpu.CompilerParams(
            dimension_semantics=("parallel",),
            vmem_limit_bytes=vmem_limit),
    )(kp, w, par, pmask)

    # ---- cross-block reduction + normalization in the wrapper -----------------
    p = jnp.sum(partials[:, 0, :], axis=0)                           # (128,)
    face_s, body_s, hand_s, body3d_s = p[0], p[1], p[2], p[3]
    b_cur, b_own, p_cur, p_own, e_cur, e_own = p[4], p[5], p[6], p[7], p[8], p[9]

    n_h = jnp.sum(dset_masks[:, 0])
    n_c = jnp.sum(dset_masks[:, 1])
    n_o = jnp.sum(dset_masks[:, 2])
    batch_body = n_h + n_c + n_o
    batch_fh = n_c + n_o
    # NOTE: NaNs when 'curated'/'own' subsets are empty — identical to PyTorch.
    total = (face_s / batch_fh + body_s / batch_body + hand_s / batch_fh
             + body3d_s / batch_body
             + (b_cur / (n_c * NB) + b_own / (n_o * NB)) / batch_fh
             + (p_cur / (n_c * P3) + p_own / (n_o * P3)) / batch_fh
             + (e_cur / (n_c * NE) + e_own / (n_o * NE)) / batch_fh)
    return total


# ---------------- pure-JAX reference (mirrors the PyTorch per-subset code) -------------
def _ref_2d(pred, gt, conf, body_idxs, hand_idxs, face_idxs):
    w = conf[..., None]
    w = jnp.where(w == -1.0, 0.0, w)

    def part(idxs):
        return jnp.sum(jnp.abs(pred[:, idxs] - gt[:, idxs]) * w[:, idxs])

    return part(face_idxs), part(body_idxs), part(hand_idxs)


def _ref_3d(pred, gt, conf, lh, rh):
    w = conf[..., None]
    pp = pred[:, np.array([lh, rh]), :].mean(axis=1, keepdims=True)
    gp = gt[:, np.array([lh, rh]), :].mean(axis=1, keepdims=True)
    return jnp.sum(jnp.abs((pred - pp) - (gt - gp)) * w)


def _ref_smplx(bp, bg, pp, pg, ep, eg, idxs):
    mse = lambda a, b: jnp.mean((a - b) ** 2)
    return mse(bp[idxs], bg[idxs]), mse(pp[idxs], pg[idxs]), mse(ep[idxs], eg[idxs])


def reference_total(pred2d, gt2d_full, conf, pred3d, gt3d, j3d_full,
                    body_idxs, hand_idxs, face_idxs, lh, rh,
                    h36m_idxs, cur_idxs, own_idxs,
                    betas_p, betas_g, pose_p, pose_g, exp_p, exp_g):
    batch_body = len(h36m_idxs) + len(cur_idxs) + len(own_idxs)
    batch_fh = len(cur_idxs) + len(own_idxs)

    def l2d(idxs):
        return _ref_2d(pred2d[idxs], gt2d_full[idxs][:, :, :-1], conf[idxs],
                       body_idxs, hand_idxs, face_idxs)

    lc, lh36, lo = l2d(cur_idxs), l2d(h36m_idxs), l2d(own_idxs)
    face_2D = (lc[0] + lh36[0] + lo[0]) / batch_fh
    body_2D = (lc[1] + lh36[1] + lo[1]) / batch_body
    hand_2D = (lc[2] + lh36[2] + lo[2]) / batch_fh

    GT3 = gt3d.at[h36m_idxs].set(j3d_full[h36m_idxs, :, :3])
    s3 = (_ref_3d(pred3d[cur_idxs], GT3[cur_idxs], conf[cur_idxs], lh, rh)
          + _ref_3d(pred3d[h36m_idxs], GT3[h36m_idxs], conf[h36m_idxs], lh, rh)
          + _ref_3d(pred3d[own_idxs], GT3[own_idxs], conf[own_idxs], lh, rh))
    body_3D = s3 / batch_body

    sc = _ref_smplx(betas_p, betas_g, pose_p, pose_g, exp_p, exp_g, cur_idxs)
    so = _ref_smplx(betas_p, betas_g, pose_p, pose_g, exp_p, exp_g, own_idxs)
    betas = (sc[0] + so[0]) / batch_fh
    pose = (sc[1] + so[1]) / batch_fh
    expl = (sc[2] + so[2]) / batch_fh
    return face_2D + body_2D + hand_2D + body_3D + betas + pose + expl


if __name__ == "__main__":
    B, K = 20, 24
    NB, NE = 10, 10                       # betas / expression dims
    pose_parts = [1, 4, 1, 2, 2]          # global_orient, body, jaw, lhand, rhand
    P = sum(pose_parts)                   # flattened pose dim = 3 * P

    # keypoint part indices (synthetic stand-ins for get_part_idxs / KEYPOINT_NAMES)
    body_idxs = np.arange(0, 12)
    hand_idxs = np.arange(12, 18)
    face_idxs = np.arange(18, 24)
    left_hip_idx, right_hip_idx = 3, 4

    part_masks = np.zeros((3, K), np.float32)     # rows: face, body, hand
    part_masks[0, face_idxs] = 1.0
    part_masks[1, body_idxs] = 1.0
    part_masks[2, hand_idxs] = 1.0
    part_masks = jnp.asarray(part_masks)

    # dataset split: 8 x h36m, 6 x curated, 6 x own
    h36m_idxs = np.arange(0, 8)
    cur_idxs = np.arange(8, 14)
    own_idxs = np.arange(14, 20)
    dset_masks = np.zeros((B, 3), np.float32)     # columns: h36m, curated, own
    dset_masks[h36m_idxs, 0] = 1.0
    dset_masks[cur_idxs, 1] = 1.0
    dset_masks[own_idxs, 2] = 1.0
    dset_masks = jnp.asarray(dset_masks)

    key = jax.random.PRNGKey(0)
    ks = jax.random.split(key, 16)
    pred2d = jax.random.normal(ks[0], (B, K, 2), jnp.float32)
    gt2d_full = jax.random.normal(ks[1], (B, K, 3), jnp.float32)
    conf = jax.random.uniform(ks[2], (B, K), jnp.float32)
    conf = conf.at[0, 5].set(-1.0).at[9, 13].set(-1.0).at[15, 2].set(-1.0)
    pred3d = jax.random.normal(ks[3], (B, K, 3), jnp.float32)
    gt3d = jax.random.normal(ks[4], (B, K, 3), jnp.float32)
    j3d_full = jax.random.normal(ks[5], (B, K, 4), jnp.float32)

    betas_p = jax.random.normal(ks[6], (B, NB), jnp.float32)
    betas_g = jax.random.normal(ks[7], (B, NB), jnp.float32)
    exp_p = jax.random.normal(ks[8], (B, NE), jnp.float32)
    exp_g = jax.random.normal(ks[9], (B, NE), jnp.float32)
    # concat of (global_orient, body_pose, jaw, lhand, rhand) along dim=1, then flatten
    pose_p = jax.random.normal(ks[10], (B, P, 3), jnp.float32).reshape(B, P * 3)
    pose_g = jax.random.normal(ks[11], (B, P, 3), jnp.float32).reshape(B, P * 3)

    # block_b=8 exercises a 3-block grid with batch padding (20 -> 24 rows).
    total = supervised_forward(
        pred2d, gt2d_full, conf, pred3d, gt3d, j3d_full,
        dset_masks, part_masks,
        betas_p, betas_g, pose_p, pose_g, exp_p, exp_g,
        left_hip_idx, right_hip_idx, block_b=8)
    total = jax.block_until_ready(total)

    ref = reference_total(
        pred2d, gt2d_full, conf, pred3d, gt3d, j3d_full,
        body_idxs, hand_idxs, face_idxs, left_hip_idx, right_hip_idx,
        h36m_idxs, cur_idxs, own_idxs,
        betas_p, betas_g, pose_p, pose_g, exp_p, exp_g)

    np.testing.assert_allclose(np.asarray(total), np.asarray(ref), rtol=1e-4, atol=1e-4)
    print("KERNEL_OK")
</pallas_src>

<mosaic_0001>
module attributes {stable_mosaic.version = 11 : i64} {
  func.func @_supervised_partials_kernel(%arg0: i32, %arg1: memref<10x8x128xf32, #tpu.memory_space<vmem>>, %arg2: memref<3x8x128xf32, #tpu.memory_space<vmem>>, %arg3: memref<2x8x384xf32, #tpu.memory_space<vmem>>, %arg4: memref<3x128xf32, #tpu.memory_space<vmem>>, %arg5: memref<1x8x128xf32, #tpu.memory_space<vmem>>) attributes {dimension_semantics = [#tpu.dimension_semantics<parallel>], iteration_bounds = array<i64: 3>, scalar_prefetch = 0 : i64, scratch_operands = 0 : i64, tpu.core_type = #tpu.core_type<tc>, window_params = [{transform_indices = @transform_0, window_bounds = array<i64: 10, 8, 128>}, {transform_indices = @transform_1, window_bounds = array<i64: 3, 8, 128>}, {transform_indices = @transform_2, window_bounds = array<i64: 2, 8, 384>}, {pipeline_mode = #tpu.pipeline_mode<synchronous>, transform_indices = @transform_3, window_bounds = array<i64: 3, 128>}, {transform_indices = @transform_4, window_bounds = array<i64: 1, 8, 128>}]} {
    %c0 = arith.constant 0 : index
    %c0_0 = arith.constant 0 : index
    %c0_1 = arith.constant 0 : index
    %0 = vector.load %arg2[%c0, %c0_0, %c0_1] : memref<3x8x128xf32, #tpu.memory_space<vmem>>, vector<1x8x128xf32>
    %1 = vector.shape_cast %0 : vector<1x8x128xf32> to vector<8x128xf32>
    %c0_2 = arith.constant 0 : index
    %c0_3 = arith.constant 0 : index
    %c0_4 = arith.constant 0 : index
    %2 = vector.load %arg1[%c0_2, %c0_3, %c0_4] : memref<10x8x128xf32, #tpu.memory_space<vmem>>, vector<1x8x128xf32>
    %3 = vector.shape_cast %2 : vector<1x8x128xf32> to vector<8x128xf32>
    %c5 = arith.constant 5 : index
    %c0_5 = arith.constant 0 : index
    %c0_6 = arith.constant 0 : index
    %4 = vector.load %arg1[%c5, %c0_5, %c0_6] : memref<10x8x128xf32, #tpu.memory_space<vmem>>, vector<1x8x128xf32>
    %5 = vector.shape_cast %4 : vector<1x8x128xf32> to vector<8x128xf32>
    %6 = arith.subf %3, %5 : vector<8x128xf32>
    %7 = math.absf %6 : vector<8x128xf32>
    %c1 = arith.constant 1 : index
    %c0_7 = arith.constant 0 : index
    %c0_8 = arith.constant 0 : index
    %8 = vector.load %arg1[%c1, %c0_7, %c0_8] : memref<10x8x128xf32, #tpu.memory_space<vmem>>, vector<1x8x128xf32>
    %9 = vector.shape_cast %8 : vector<1x8x128xf32> to vector<8x128xf32>
    %c6 = arith.constant 6 : index
    %c0_9 = arith.constant 0 : index
    %c0_10 = arith.constant 0 : index
    %10 = vector.load %arg1[%c6, %c0_9, %c0_10] : memref<10x8x128xf32, #tpu.memory_space<vmem>>, vector<1x8x128xf32>
    %11 = vector.shape_cast %10 : vector<1x8x128xf32> to vector<8x128xf32>
    %12 = arith.subf %9, %11 : vector<8x128xf32>
    %13 = math.absf %12 : vector<8x128xf32>
    %14 = arith.addf %7, %13 : vector<8x128xf32>
    %15 = arith.mulf %14, %1 : vector<8x128xf32>
    %cst = arith.constant dense<0.000000e+00> : vector<128xf32>
    %16 = vector.multi_reduction <add>, %15, %cst [0] : vector<8x128xf32> to vector<128xf32>
    %17 = vector.shape_cast %16 : vector<128xf32> to vector<1x128xf32>
    %c0_11 = arith.constant 0 : index
    %c0_12 = arith.constant 0 : index
    %18 = vector.load %arg4[%c0_11, %c0_12] : memref<3x128xf32, #tpu.memory_space<vmem>>, vector<3x128xf32>
    %19 = vector.extract_strided_slice %18 {offsets = [0, 0], sizes = [1, 128], strides = [1, 1]} : vector<3x128xf32> to vector<1x128xf32>
    %20 = arith.mulf %17, %19 : vector<1x128xf32>
    %21 = vector.shape_cast %20 : vector<1x128xf32> to vector<1x1x128xf32>
    %cst_13 = arith.constant dense<0.000000e+00> : vector<1xf32>
    %22 = vector.multi_reduction <add>, %21, %cst_13 [1, 2] : vector<1x1x128xf32> to vector<1xf32>
    %23 = vector.shape_cast %22 : vector<1xf32> to vector<1x1x1xf32>
    %24 = vector.extract %23[0, 0, 0] : f32 from vector<1x1x1xf32>
    %25 = vector.extract_strided_slice %18 {offsets = [1, 0], sizes = [1, 128], strides = [1, 1]} : vector<3x128xf32> to vector<1x128xf32>
    %26 = arith.mulf %17, %25 : vector<1x128xf32>
    %27 = vector.shape_cast %26 : vector<1x128xf32> to vector<1x1x128xf32>
    %cst_14 = arith.constant dense<0.000000e+00> : vector<1xf32>
    %28 = vector.multi_reduction <add>, %27, %cst_14 [1, 2] : vector<1x1x128xf32> to vector<1xf32>
    %29 = vector.shape_cast %28 : vector<1xf32> to vector<1x1x1xf32>
    %30 = vector.extract %29[0, 0, 0] : f32 from vector<1x1x1xf32>
    %31 = vector.extract_strided_slice %18 {offsets = [2, 0], sizes = [1, 128], strides = [1, 1]} : vector<3x128xf32> to vector<1x128xf32>
    %32 = arith.mulf %17, %31 : vector<1x128xf32>
    %33 = vector.shape_cast %32 : vector<1x128xf32> to vector<1x1x128xf32>
    %cst_15 = arith.constant dense<0.000000e+00> : vector<1xf32>
    %34 = vector.multi_reduction <add>, %33, %cst_15 [1, 2] : vector<1x1x128xf32> to vector<1xf32>
    %35 = vector.shape_cast %34 : vector<1xf32> to vector<1x1x1xf32>
    %36 = vector.extract %35[0, 0, 0] : f32 from vector<1x1x1xf32>
    %c1_16 = arith.constant 1 : index
    %c0_17 = arith.constant 0 : index
    %c0_18 = arith.constant 0 : index
    %37 = vector.load %arg2[%c1_16, %c0_17, %c0_18] : memref<3x8x128xf32, #tpu.memory_space<vmem>>, vector<1x8x128xf32>
    %38 = vector.shape_cast %37 : vector<1x8x128xf32> to vector<8x128xf32>
    %c2 = arith.constant 2 : index
    %c0_19 = arith.constant 0 : index
    %c0_20 = arith.constant 0 : index
    %39 = vector.load %arg1[%c2, %c0_19, %c0_20] : memref<10x8x128xf32, #tpu.memory_space<vmem>>, vector<1x8x128xf32>
    %40 = vector.shape_cast %39 : vector<1x8x128xf32> to vector<8x128xf32>
    %c7 = arith.constant 7 : index
    %c0_21 = arith.constant 0 : index
    %c0_22 = arith.constant 0 : index
    %41 = vector.load %arg1[%c7, %c0_21, %c0_22] : memref<10x8x128xf32, #tpu.memory_space<vmem>>, vector<1x8x128xf32>
    %42 = vector.shape_cast %41 : vector<1x8x128xf32> to vector<8x128xf32>
    %43 = arith.subf %40, %42 : vector<8x128xf32>
    %44 = math.absf %43 : vector<8x128xf32>
    %c3 = arith.constant 3 : index
    %c0_23 = arith.constant 0 : index
    %c0_24 = arith.constant 0 : index
    %45 = vector.load %arg1[%c3, %c0_23, %c0_24] : memref<10x8x128xf32, #tpu.memory_space<vmem>>, vector<1x8x128xf32>
    %46 = vector.shape_cast %45 : vector<1x8x128xf32> to vector<8x128xf32>
    %c8 = arith.constant 8 : index
    %c0_25 = arith.constant 0 : index
    %c0_26 = arith.constant 0 : index
    %47 = vector.load %arg1[%c8, %c0_25, %c0_26] : memref<10x8x128xf32, #tpu.memory_space<vmem>>, vector<1x8x128xf32>
    %48 = vector.shape_cast %47 : vector<1x8x128xf32> to vector<8x128xf32>
    %49 = arith.subf %46, %48 : vector<8x128xf32>
    %50 = math.absf %49 : vector<8x128xf32>
    %51 = arith.addf %44, %50 : vector<8x128xf32>
    %c4 = arith.constant 4 : index
    %c0_27 = arith.constant 0 : index
    %c0_28 = arith.constant 0 : index
    %52 = vector.load %arg1[%c4, %c0_27, %c0_28] : memref<10x8x128xf32, #tpu.memory_space<vmem>>, vector<1x8x128xf32>
    %53 = vector.shape_cast %52 : vector<1x8x128xf32> to vector<8x128xf32>
    %c9 = arith.constant 9 : index
    %c0_29 = arith.constant 0 : index
    %c0_30 = arith.constant 0 : index
    %54 = vector.load %arg1[%c9, %c0_29, %c0_30] : memref<10x8x128xf32, #tpu.memory_space<vmem>>, vector<1x8x128xf32>
    %55 = vector.shape_cast %54 : vector<1x8x128xf32> to vector<8x128xf32>
    %56 = arith.subf %53, %55 : vector<8x128xf32>
    %57 = math.absf %56 : vector<8x128xf32>
    %58 = arith.addf %51, %57 : vector<8x128xf32>
    %59 = arith.mulf %58, %38 : vector<8x128xf32>
    %60 = vector.shape_cast %59 : vector<8x128xf32> to vector<1x8x128xf32>
    %cst_31 = arith.constant dense<0.000000e+00> : vector<1xf32>
    %61 = vector.multi_reduction <add>, %60, %cst_31 [1, 2] : vector<1x8x128xf32> to vector<1xf32>
    %62 = vector.shape_cast %61 : vector<1xf32> to vector<1x1x1xf32>
    %63 = vector.extract %62[0, 0, 0] : f32 from vector<1x1x1xf32>
    %c0_32 = arith.constant 0 : index
    %c0_33 = arith.constant 0 : index
    %c0_34 = arith.constant 0 : index
    %64 = vector.load %arg3[%c0_32, %c0_33, %c0_34] : memref<2x8x384xf32, #tpu.memory_space<vmem>>, vector<1x8x384xf32>
    %65 = vector.shape_cast %64 : vector<1x8x384xf32> to vector<8x384xf32>
    %c1_35 = arith.constant 1 : index
    %c0_36 = arith.constant 0 : index
    %c0_37 = arith.constant 0 : index
    %66 = vector.load %arg3[%c1_35, %c0_36, %c0_37] : memref<2x8x384xf32, #tpu.memory_space<vmem>>, vector<1x8x384xf32>
    %67 = vector.shape_cast %66 : vector<1x8x384xf32> to vector<8x384xf32>
    %68 = arith.subf %65, %67 : vector<8x384xf32>
    %69 = arith.mulf %68, %68 : vector<8x384xf32>
    %70 = vector.extract_strided_slice %69 {offsets = [0, 0], sizes = [8, 128], strides = [1, 1]} : vector<8x384xf32> to vector<8x128xf32>
    %cst_38 = arith.constant dense<0.000000e+00> : vector<8xf32>
    %71 = vector.multi_reduction <add>, %70, %cst_38 [1] : vector<8x128xf32> to vector<8xf32>
    %72 = vector.shape_cast %71 : vector<8xf32> to vector<8x1xf32>
    %73 = vector.extract_strided_slice %69 {offsets = [0, 128], sizes = [8, 128], strides = [1, 1]} : vector<8x384xf32> to vector<8x128xf32>
    %cst_39 = arith.constant dense<0.000000e+00> : vector<8xf32>
    %74 = vector.multi_reduction <add>, %73, %cst_39 [1] : vector<8x128xf32> to vector<8xf32>
    %75 = vector.shape_cast %74 : vector<8xf32> to vector<8x1xf32>
    %76 = vector.extract_strided_slice %69 {offsets = [0, 256], sizes = [8, 128], strides = [1, 1]} : vector<8x384xf32> to vector<8x128xf32>
    %cst_40 = arith.constant dense<0.000000e+00> : vector<8xf32>
    %77 = vector.multi_reduction <add>, %76, %cst_40 [1] : vector<8x128xf32> to vector<8xf32>
    %78 = vector.shape_cast %77 : vector<8xf32> to vector<8x1xf32>
    %c2_41 = arith.constant 2 : index
    %c0_42 = arith.constant 0 : index
    %c0_43 = arith.constant 0 : index
    %79 = vector.load %arg2[%c2_41, %c0_42, %c0_43] : memref<3x8x128xf32, #tpu.memory_space<vmem>>, vector<1x8x1xf32>
    %80 = vector.shape_cast %79 : vector<1x8x1xf32> to vector<8x1xf32>
    %c2_44 = arith.constant 2 : index
    %c0_45 = arith.constant 0 : index
    %c1_46 = arith.constant 1 : index
    %81 = vector.load %arg2[%c2_44, %c0_45, %c1_46] : memref<3x8x128xf32, #tpu.memory_space<vmem>>, vector<1x8x1xf32>
    %82 = vector.shape_cast %81 : vector<1x8x1xf32> to vector<8x1xf32>
    %83 = arith.mulf %72, %80 : vector<8x1xf32>
    %84 = vector.shape_cast %83 : vector<8x1xf32> to vector<1x8x1xf32>
    %cst_47 = arith.constant dense<0.000000e+00> : vector<1xf32>
    %85 = vector.multi_reduction <add>, %84, %cst_47 [1, 2] : vector<1x8x1xf32> to vector<1xf32>
    %86 = vector.shape_cast %85 : vector<1xf32> to vector<1x1x1xf32>
    %87 = vector.extract %86[0, 0, 0] : f32 from vector<1x1x1xf32>
    %88 = arith.mulf %72, %82 : vector<8x1xf32>
    %89 = vector.shape_cast %88 : vector<8x1xf32> to vector<1x8x1xf32>
    %cst_48 = arith.constant dense<0.000000e+00> : vector<1xf32>
    %90 = vector.multi_reduction <add>, %89, %cst_48 [1, 2] : vector<1x8x1xf32> to vector<1xf32>
    %91 = vector.shape_cast %90 : vector<1xf32> to vector<1x1x1xf32>
    %92 = vector.extract %91[0, 0, 0] : f32 from vector<1x1x1xf32>
    %93 = arith.mulf %75, %80 : vector<8x1xf32>
    %94 = vector.shape_cast %93 : vector<8x1xf32> to vector<1x8x1xf32>
    %cst_49 = arith.constant dense<0.000000e+00> : vector<1xf32>
    %95 = vector.multi_reduction <add>, %94, %cst_49 [1, 2] : vector<1x8x1xf32> to vector<1xf32>
    %96 = vector.shape_cast %95 : vector<1xf32> to vector<1x1x1xf32>
    %97 = vector.extract %96[0, 0, 0] : f32 from vector<1x1x1xf32>
    %98 = arith.mulf %75, %82 : vector<8x1xf32>
    %99 = vector.shape_cast %98 : vector<8x1xf32> to vector<1x8x1xf32>
    %cst_50 = arith.constant dense<0.000000e+00> : vector<1xf32>
    %100 = vector.multi_reduction <add>, %99, %cst_50 [1, 2] : vector<1x8x1xf32> to vector<1xf32>
    %101 = vector.shape_cast %100 : vector<1xf32> to vector<1x1x1xf32>
    %102 = vector.extract %101[0, 0, 0] : f32 from vector<1x1x1xf32>
    %103 = arith.mulf %78, %80 : vector<8x1xf32>
    %104 = vector.shape_cast %103 : vector<8x1xf32> to vector<1x8x1xf32>
    %cst_51 = arith.constant dense<0.000000e+00> : vector<1xf32>
    %105 = vector.multi_reduction <add>, %104, %cst_51 [1, 2] : vector<1x8x1xf32> to vector<1xf32>
    %106 = vector.shape_cast %105 : vector<1xf32> to vector<1x1x1xf32>
    %107 = vector.extract %106[0, 0, 0] : f32 from vector<1x1x1xf32>
    %108 = arith.mulf %78, %82 : vector<8x1xf32>
    %109 = vector.shape_cast %108 : vector<8x1xf32> to vector<1x8x1xf32>
    %cst_52 = arith.constant dense<0.000000e+00> : vector<1xf32>
    %110 = vector.multi_reduction <add>, %109, %cst_52 [1, 2] : vector<1x8x1xf32> to vector<1xf32>
    %111 = vector.shape_cast %110 : vector<1xf32> to vector<1x1x1xf32>
    %112 = vector.extract %111[0, 0, 0] : f32 from vector<1x1x1xf32>
    %113 = tpu.iota {dimensions = array<i32: 1>} : vector<8x128xi32>
    %cst_53 = arith.constant 0.000000e+00 : f32
    %114 = vector.broadcast %cst_53 : f32 to vector<8x128xf32>
    %c0_i32 = arith.constant 0 : i32
    %115 = vector.broadcast %c0_i32 : i32 to vector<8x128xi32>
    %116 = arith.cmpi eq, %113, %115 : vector<8x128xi32>
    %117 = vector.broadcast %24 : f32 to vector<8x128xf32>
    %118 = arith.select %116, %117, %114 : vector<8x128xi1>, vector<8x128xf32>
    %c1_i32 = arith.constant 1 : i32
    %119 = vector.broadcast %c1_i32 : i32 to vector<8x128xi32>
    %120 = arith.cmpi eq, %113, %119 : vector<8x128xi32>
    %121 = vector.broadcast %30 : f32 to vector<8x128xf32>
    %122 = arith.select %120, %121, %118 : vector<8x128xi1>, vector<8x128xf32>
    %c2_i32 = arith.constant 2 : i32
    %123 = vector.broadcast %c2_i32 : i32 to vector<8x128xi32>
    %124 = arith.cmpi eq, %113, %123 : vector<8x128xi32>
    %125 = vector.broadcast %36 : f32 to vector<8x128xf32>
    %126 = arith.select %124, %125, %122 : vector<8x128xi1>, vector<8x128xf32>
    %c3_i32 = arith.constant 3 : i32
    %127 = vector.broadcast %c3_i32 : i32 to vector<8x128xi32>
    %128 = arith.cmpi eq, %113, %127 : vector<8x128xi32>
    %129 = vector.broadcast %63 : f32 to vector<8x128xf32>
    %130 = arith.select %128, %129, %126 : vector<8x128xi1>, vector<8x128xf32>
    %c4_i32 = arith.constant 4 : i32
    %131 = vector.broadcast %c4_i32 : i32 to vector<8x128xi32>
    %132 = arith.cmpi eq, %113, %131 : vector<8x128xi32>
    %133 = vector.broadcast %87 : f32 to vector<8x128xf32>
    %134 = arith.select %132, %133, %130 : vector<8x128xi1>, vector<8x128xf32>
    %c5_i32 = arith.constant 5 : i32
    %135 = vector.broadcast %c5_i32 : i32 to vector<8x128xi32>
    %136 = arith.cmpi eq, %113, %135 : vector<8x128xi32>
    %137 = vector.broadcast %92 : f32 to vector<8x128xf32>
    %138 = arith.select %136, %137, %134 : vector<8x128xi1>, vector<8x128xf32>
    %c6_i32 = arith.constant 6 : i32
    %139 = vector.broadcast %c6_i32 : i32 to vector<8x128xi32>
    %140 = arith.cmpi eq, %113, %139 : vector<8x128xi32>
    %141 = vector.broadcast %97 : f32 to vector<8x128xf32>
    %142 = arith.select %140, %141, %138 : vector<8x128xi1>, vector<8x128xf32>
    %c7_i32 = arith.constant 7 : i32
    %143 = vector.broadcast %c7_i32 : i32 to vector<8x128xi32>
    %144 = arith.cmpi eq, %113, %143 : vector<8x128xi32>
    %145 = vector.broadcast %102 : f32 to vector<8x128xf32>
    %146 = arith.select %144, %145, %142 : vector<8x128xi1>, vector<8x128xf32>
    %c8_i32 = arith.constant 8 : i32
    %147 = vector.broadcast %c8_i32 : i32 to vector<8x128xi32>
    %148 = arith.cmpi eq, %113, %147 : vector<8x128xi32>
    %149 = vector.broadcast %107 : f32 to vector<8x128xf32>
    %150 = arith.select %148, %149, %146 : vector<8x128xi1>, vector<8x128xf32>
    %c9_i32 = arith.constant 9 : i32
    %151 = vector.broadcast %c9_i32 : i32 to vector<8x128xi32>
    %152 = arith.cmpi eq, %113, %151 : vector<8x128xi32>
    %153 = vector.broadcast %112 : f32 to vector<8x128xf32>
    %154 = arith.select %152, %153, %150 : vector<8x128xi1>, vector<8x128xf32>
    %c0_54 = arith.constant 0 : index
    %c0_55 = arith.constant 0 : index
    %c0_56 = arith.constant 0 : index
    %155 = vector.load %arg5[%c0_54, %c0_55, %c0_56] : memref<1x8x128xf32, #tpu.memory_space<vmem>>, vector<1x8x128xf32>
    %156 = vector.shape_cast %155 : vector<1x8x128xf32> to vector<8x128xf32>
    %157 = vector.shape_cast %154 : vector<8x128xf32> to vector<1x8x128xf32>
    tpu.vector_store %arg5[%c0_54, %c0_55, %c0_56], %157 {strides = array<i32>} : memref<1x8x128xf32, #tpu.memory_space<vmem>>, vector<1x8x128xf32>,
    return
  }
  func.func @transform_0(%arg0: i32) -> (i32, i32, i32) {
    %c0_i32 = arith.constant 0 : i32
    %c0_i32_0 = arith.constant 0 : i32
    %c0_i32_1 = arith.constant 0 : i32
    return %c0_i32, %arg0, %c0_i32_0 : i32, i32, i32
  }
  func.func @transform_1(%arg0: i32) -> (i32, i32, i32) {
    %c0_i32 = arith.constant 0 : i32
    %c0_i32_0 = arith.constant 0 : i32
    %c0_i32_1 = arith.constant 0 : i32
    return %c0_i32, %arg0, %c0_i32_0 : i32, i32, i32
  }
  func.func @transform_2(%arg0: i32) -> (i32, i32, i32) {
    %c0_i32 = arith.constant 0 : i32
    %c0_i32_0 = arith.constant 0 : i32
    %c0_i32_1 = arith.constant 0 : i32
    return %c0_i32, %arg0, %c0_i32_0 : i32, i32, i32
  }
  func.func @transform_3(%arg0: i32) -> (i32, i32) {
    %c0_i32 = arith.constant 0 : i32
    %c0_i32_0 = arith.constant 0 : i32
    %c0_i32_1 = arith.constant 0 : i32
    return %c0_i32, %c0_i32_0 : i32, i32
  }
  func.func @transform_4(%arg0: i32) -> (i32, i32, i32) {
    %c0_i32 = arith.constant 0 : i32
    %c0_i32_0 = arith.constant 0 : i32
    %c0_i32_1 = arith.constant 0 : i32
    return %arg0, %c0_i32, %c0_i32_0 : i32, i32, i32
  }
}

</mosaic_0001>

<bundles_post_ra>
// kernel: tpu_custom_call.1
= control target key start
LH: loop header
LB: loop body
LE: loop exit
PB: predicated region body
PF: predicated region fallthrough
CT: control target
= control target key end

     0   :  { %s1224_s0 = inlined_call_operand.hbm [shape: f32[10,24,128], index: 0, kind: input, shape index: {}]   ;;  %s1225_s1 = inlined_call_operand.hbm [shape: f32[3,24,128], index: 1, kind: input, shape index: {}]   ;;  %s1226_s2 = inlined_call_operand.hbm [shape: f32[2,24,384], index: 2, kind: input, shape index: {}]   ;;  %s1227_s3 = inlined_call_operand.vmem [shape: f32[3,128], index: 3, kind: input, shape index: {}]   ;;  %s1228_s4 = inlined_call_operand.hbm [shape: f32[3,8,128], index: 4, kind: output, shape index: {}]  }
   0x1   :  { %1237 = sst [smem:[#allocation16_spill]] %s1225_s1 }
   0x2   :  { %9 = vsyncpa [#allocation3], 0 }
   0x3   :  { %11 = vsyncpa [#allocation3 + $0x1], 0 }
   0x4   :  { %12 = vsyncpa [#allocation6], 0 }
   0x5   :  { %14 = vsyncpa [#allocation6 + $0x1], 0 }
   0x6   :  { %15 = vsyncpa [#allocation4], 0 }
   0x7   :  { %17 = vsyncpa [#allocation4 + $0x1], 0  ;;  %s950_s15 = smov 0   ;;  %s952_s16 = smov 0  }
   0x8   :  { %s954_s17 = smov 0   ;;  %s956_s18 = smov 0  }
   0x9 LB: > { %1238 = sst [smem:[#allocation12_spill]] %s909_s17  ;;  %s971_s19 = sadd.s32 4294967295, %s913_s18   ;;  %s913_s18 = sphi %s956_s18, %s1256_s18   ;;  %s909_s17 = sphi %s954_s17, %s1258_s17   ;;  %s905_s16 = sphi %s952_s16, %s1260_s16   ;;  %s901_s15 = sphi %s950_s15, %s1259_s15  }
   0xa   : > { %s638_s20 = sadd.s32 4294967294, %s913_s18   ;;  %s975_s21 = sadd.s32 1, %s913_s18  }
   0xb   : > { %1239 = sst [smem:[#allocation13_spill]] %s975_s21  ;;  %s30_s22 = sadd.s32 1, %s909_s17 }
   0xc   : > { %s27_s23 = ssub.s32 %s913_s18, %s975_s21  ;;  %p37_p0 = scmp.ne.s32.totalorder %s909_s17, %s905_s16 }
   0xd   : > { %p28_p1 = scmp.eq.s32.totalorder %s27_s23, 0  ;;  %p38_p2 = scmp.eq.s32.totalorder %s913_s18, 0 }
   0xe   : > { %p43_p3 = scmp.ne.s32.totalorder %s905_s16, %s901_s15  ;;  %p44_p4 = scmp.eq.s32.totalorder %s971_s19, 0 }
   0xf   : > { %s987_s24 = scalar_select %p28_p1, %s909_s17, %s30_s22  }
  0x10   : > { %p39_p5 = por %p38_p2, %p37_p0  ;;  %p989_p6 = por %p44_p4, %p43_p3 }
  0x11   : > { %1240 = sst [smem:[#allocation14_spill]] %s987_s24  ;;  %p140_p7 = scmp.eq.s32.totalorder %s971_s19, 2 }
  0x12   : > { %s1241_s25 = scalar_select %p989_p6, 1, 0 }
  0x13   : > { %p146_p8 = scmp.eq.s32.totalorder %s638_s20, 2  ;;  %p713_p9 = scmp.lt.s32.totalorder %s913_s18, 3 }
  0x14   : > { %p995_p10 = por %p140_p7, %p37_p0  ;;  %s1004_s28 = sand.u32 1, %s909_s17  }
  0x15   : > { %p999_p11 = por %p146_p8, %p43_p3  ;;  %s641_s29 = sshll.u32 %s913_s18, 7 }
  0x16   : > { %s1242_s26 = scalar_select %p995_p10, 1, 0 }
  0x17   : > { %s1243_s27 = scalar_select %p999_p11, 1, 0 }
  0x18   : > { %p1007_p12 = pnand %p713_p9, %p39_p5  ;;  %s189_s5 = sand.u32 1, %s913_s18  }
  0x19   : > { %1244 = sst [smem:[#allocation15_spill]] %s1243_s27  ;;  %s665_s6 = smul.u32 24, %s1004_s28 }
  0x1a   : > { %s1246_s1 = sld [smem:[#allocation16_spill]]  ;;  %p644_p13 = scmp.ge.s32.totalorder %s913_s18, 1 }
  0x1b   : > { %p228_p0 = scmp.lt.s32.totalorder %s913_s18, 4  ;;  %s193_s10 = scalar_lea.vmem [#allocation5], %s665_s6 }
  0x1c   : > { %s199_s11 = sshll.u32 %s193_s10, 4  ;;  %s1028_s13 = scalar_lea.sflag [#allocation6], %s189_s5  ;;  %s1022_s11 = int_to_ptr.vmem [resolvable:$true] %s199_s11 }
  0x1d   : > { %p1024_p1 = pnand %p644_p13, %p228_p0  ;;  %p1034_p3 = pneg %p1007_p12 }
  0x1f   : > { %s1247_s12 = scalar_select %p1024_p1, 1, 0 }
  0x20   : > { %s1018_s9 = scalar_lea.hbm %s1246_s1, %s641_s29  ;;  %s758_s6 = scalar_lea.hbm %s1246_s1, 1152 }
  0x21   : > { %s753_s14 = scalar_lea.hbm %s1018_s9, 384  ;;  %p759_p7 = scmp.lt.u32.totalorder %s1018_s9, %s1246_s1 }
  0x22   : > { %p754_p2 = scmp.ne.s32.totalorder %s1018_s9, %s753_s14  ;;  %p760_p8 = scmp.lt.u32.totalorder %s758_s6, %s753_s14 }
  0x23   : > { %p762_p13 = scmp.lt.u32.totalorder %s753_s14, %s1018_s9 }
  0x24   : > { %p756_p4 = pnand %p1034_p3, %p754_p2  ;;  %p761_p9 = por %p760_p8, %p759_p7 }
  0x26   : > { %p757_p5 = pneg %p756_p4  ;;  %p763_p0 = por %p762_p13, %p761_p9 }
  0x28   : > { %p764_p11 = pnand %p763_p0, %p757_p5 }
  0x2a   : > { %767 = shalt.err (!%p764_p11)
}
  0x2b   : > { %s768_s5 = scalar_lea.vmem %s1022_s11, 384  ;;  %s915_s10 = smov [#allocation5]  }
  0x2c   : > { %p769_p2 = scmp.ne.s32.totalorder %s1022_s11, %s768_s5  ;;  %s773_s22 = sshll.u32 %s915_s10, 4  ;;  %s774_s22 = int_to_ptr.vmem [resolvable:$false] %s773_s22 }
  0x2d   : > { %s775_s23 = scalar_lea.vmem %s774_s22, 768  ;;  %p776_p6 = scmp.lt.s32.totalorder %s1022_s11, %s774_s22 }
  0x2e   : > { %p771_p4 = pnand %p769_p2, %p1034_p3  ;;  %p777_p1 = scmp.lt.s32.totalorder %s775_s23, %s768_s5 }
  0x30   : > { %p772_p10 = pneg %p771_p4  ;;  %p778_p7 = por %p777_p1, %p776_p6 }
  0x32   : > { %p779_p8 = pnand %p778_p7, %p772_p10 }
  0x34   : > { %782 = shalt.err (!%p779_p8)
}
  0x35   : > { %s1235_s14 = smov 384   ;;  %s917_s6 = smov 128  }
  0x36   : > { %s918_s7 = smov 8   ;;  %s664_s8 = smul.u32 80, %s1004_s28 }
  0x37   : > { %705 = dma.hbm_to_vmem [thread:$0]  (!%p1007_p12), %s1018_s9, 384, %s1022_s11, %s1028_s13, %s1235_s14, %s917_s6, %s918_s7  }
  0x38   : > { %s1067_s22 = scalar_lea.hbm %s1224_s0, %s641_s29  ;;  %s667_s1 = smul.u32 384, %s913_s18 }
  0x39   : > { %s173_s24 = scalar_lea.vmem [#allocation2], %s664_s8  ;;  %s170_s11 = scalar_lea.sflag [#allocation3], %s1004_s28 }
  0x3a   : > { %s179_s17 = sshll.u32 %s173_s24, 4  ;;  %s1076_s9 = scalar_lea.hbm %s1226_s2, %s667_s1  ;;  %s1071_s17 = int_to_ptr.vmem [resolvable:$true] %s179_s17 }
  0x3b   : > { %s783_s14 = scalar_lea.hbm %s1067_s22, 1280  ;;  %s788_s10 = scalar_lea.hbm %s1224_s0, 3840 }
  0x3c   : > { %p784_p6 = scmp.ne.s32.totalorder %s1067_s22, %s783_s14  ;;  %p789_p1 = scmp.lt.u32.totalorder %s1067_s22, %s1224_s0 }
  0x3d   : > { %p790_p5 = scmp.lt.u32.totalorder %s788_s10, %s783_s14  ;;  %p792_p13 = scmp.lt.u32.totalorder %s783_s14, %s1067_s22 }
  0x3e   : > { %p786_p10 = pnand %p784_p6, %p1034_p3 }
  0x3f   : > { %p791_p9 = por %p790_p5, %p789_p1 }
  0x40   : > { %p787_p11 = pneg %p786_p10 }
  0x41   : > { %p793_p0 = por %p792_p13, %p791_p9 }
  0x43   : > { %p794_p2 = pnand %p793_p0, %p787_p11 }
  0x45   : > { %797 = shalt.err (!%p794_p2)
}
  0x46   : > { %s798_s1 = scalar_lea.vmem %s1071_s17, 1280  ;;  %s919_s21 = smov [#allocation2]  }
  0x47   : > { %p799_p4 = scmp.ne.s32.totalorder %s1071_s17, %s798_s1  ;;  %s803_s24 = sshll.u32 %s919_s21, 4  ;;  %s804_s24 = int_to_ptr.vmem [resolvable:$false] %s803_s24 }
  0x48   : > { %s805_s27 = scalar_lea.vmem %s804_s24, 2560  ;;  %p806_p6 = scmp.lt.s32.totalorder %s1071_s17, %s804_s24 }
  0x49   : > { %p801_p7 = pnand %p799_p4, %p1034_p3  ;;  %p807_p10 = scmp.lt.s32.totalorder %s805_s27, %s798_s1 }
  0x4b   : > { %p802_p8 = pneg %p801_p7  ;;  %p808_p1 = por %p807_p10, %p806_p6 }
  0x4d   : > { %p809_p5 = pnand %p808_p1, %p802_p8 }
  0x4f   : > { %812 = shalt.err (!%p809_p5)
}
  0x50   : > { %s1249_s14 = smov 384   ;;  %s1250_s23 = smul.u32 48, %s1004_s28 }
  0x51   : > { %702 = dma.hbm_to_vmem [thread:$0]  (!%p1007_p12), %s1067_s22, 1280, %s1071_s17, %s170_s11, %s1249_s14, %s917_s6, %s918_s7  }
  0x52   : > { %s213_s29 = scalar_lea.vmem [#allocation7], %s1250_s23  ;;  %s813_s10 = scalar_lea.hbm %s1076_s9, 768 }
  0x53   : > { %s220_s5 = sshll.u32 %s213_s29, 4  ;;  %p814_p11 = scmp.ne.s32.totalorder %s1076_s9, %s813_s10  ;;  %s1107_s5 = int_to_ptr.vmem [resolvable:$true] %s220_s5 }
  0x54   : > { %s818_s21 = scalar_lea.hbm %s1226_s2, 2304  ;;  %p819_p0 = scmp.lt.u32.totalorder %s1076_s9, %s1226_s2 }
  0x55   : > { %p816_p9 = pnand %p814_p11, %p1034_p3  ;;  %p820_p2 = scmp.lt.u32.totalorder %s818_s21, %s813_s10 }
  0x56   : > { %p822_p7 = scmp.lt.u32.totalorder %s813_s10, %s1076_s9 }
  0x57   : > { %p817_p13 = pneg %p816_p9  ;;  %p821_p4 = por %p820_p2, %p819_p0 }
  0x59   : > { %p823_p8 = por %p822_p7, %p821_p4 }
  0x5b   : > { %p824_p6 = pnand %p823_p8, %p817_p13 }
  0x5d   : > { %827 = shalt.err (!%p824_p6)
}
  0x5e   : > { %s828_s17 = scalar_lea.vmem %s1107_s5, 768  ;;  %s920_s28 = smov [#allocation7]  }
  0x5f   : > { %p829_p10 = scmp.ne.s32.totalorder %s1107_s5, %s828_s17  ;;  %s833_s6 = sshll.u32 %s920_s28, 4  ;;  %s834_s6 = int_to_ptr.vmem [resolvable:$false] %s833_s6 }
  0x60   : > { %s835_s7 = scalar_lea.vmem %s834_s6, 1536  ;;  %p836_p11 = scmp.lt.s32.totalorder %s1107_s5, %s834_s6 }
  0x61   : > { %p831_p1 = pnand %p829_p10, %p1034_p3  ;;  %p837_p9 = scmp.lt.s32.totalorder %s835_s7, %s828_s17 }
  0x63   : > { %p832_p5 = pneg %p831_p1  ;;  %p838_p0 = por %p837_p9, %p836_p11 }
  0x65   : > { %p839_p2 = pnand %p838_p0, %p832_p5 }
  0x67   : > { %842 = shalt.err (!%p839_p2)
}
  0x68   : > { %s921_s22 = smov 1152   ;;  %s922_s11 = smov 24  }
  0x69   : > { %708 = dma.hbm_to_vmem [thread:$0]  (!%p1007_p12), %s1076_s9, 768, %s1107_s5, %s1028_s13, %s921_s22, %s1249_s14, %s922_s11  }
  0x6a   : > { %p1251_p3 = scmp.ne.s32.totalorder %s1247_s12, 0 }
  0x6b   : > { %s1135_s20 = sand.u32 (!%p1251_p3), 1, %s905_s16   ;;  %p1252_p13 = scmp.ne.s32.totalorder (!%p1251_p3), %s1241_s25, 0 }
  0x6c   : > { %232 = sbr.rel (%p1251_p3) target bundleno = 616 (0x268), region = 36  ;;  %s235_s29 = scalar_lea.sflag (!%p1251_p3), [#allocation3], %s1135_s20 }
  0x6d   : > { %s668_s23 = smul.u32 (!%p1251_p3), 80, %s1135_s20 }
  0x6f   : > { %s1139_s10 = scalar_lea.vmem (!%p1251_p3), [#allocation2], %s668_s23 }
  0x73   : > { %888 = dma.done.wait (%p1252_p13), %s235_s29, 1280  }
  0x74   : > { %890 = vsyncadd (%p1252_p13), %s235_s29, 4294966016  ;;  %s243_s30 = sand.u32 1, %s971_s19   ;;  %s669_s12 = smul.u32 24, %s1135_s20 }
  0x75   : > { %s244_s13 = scalar_lea.sflag [#allocation6], %s243_s30 }
  0x76   : > { %s1147_s9 = scalar_lea.vmem [#allocation5], %s669_s12 }
  0x77   : > { %892 = dma.done.wait (%p1252_p13), %s244_s13, 1152  }
  0x78   : > { %894 = vsyncadd (%p1252_p13), %s244_s13, 4294966144  ;;  %s670_s14 = smul.u32 48, %s1135_s20  ;;  %v292_v12 = vld [vmem:[%s1139_s10] sm:$0xff]  ;;  %v646_v13 = vld [vmem:[%s1139_s10 + $0x28] sm:$0xff]  ;;  %s923_s25 = smov 127   ;;  %vm313_vm0 = vcmask 1040384  }
  0x79   : > { %v647_v14 = vld [vmem:[%s1139_s10 + $0x8] sm:$0xff]  ;;  %v648_v15 = vld [vmem:[%s1139_s10 + $0x30] sm:$0xff]  ;;  %v295_v16 = vsub.f32 %v292_v12, %v646_v13  ;;  %v651_v38 = vld [vmem:[%s1139_s10 + $0x38] sm:$0xff]  ;;  %vm403_vm1 = vcmask 7168   ;;  %s645_s7 = sshll.u32 %s1135_s20, 3  ;;  %s661_s29 = sshll.u32 %s971_s19, 7 }
  0x7a   : > { %s256_s5 = scalar_lea.vmem [#allocation7], %s670_s14  ;;  %v301_v17 = vsub.f32 %v647_v14, %v648_v15  ;;  %v291_v21 = vld [vmem:[%s1147_s9] sm:$0xff]  ;;  %v659_v22 = vld [vmem:[%s1147_s9 + $0x10] sm:$0xff]  ;;  %v649_v57 = vld [vmem:[%s1147_s9 + $0x8] sm:$0xff]  ;;  %s1181_s14 = scalar_lea.hbm %s1228_s4, %s661_s29 }
  0x7b   : > { %v381_v0 = vld [vmem:[%s256_s5] sm:$0xff]  ;;  %v656_v1 = vld [vmem:[%s256_s5 + $0x18] sm:$0xff]  ;;  %v383_v2 = vld [vmem:[%s256_s5 + $0x10] sm:$0xff]  ;;  %v296_v18 = vand.u32 2147483647, %v295_v16  ;;  %p1253_p4 = scmp.ne.s32.totalorder %s1242_s26, 0 }
  0x7c   : > { %v388_v3 = vsub.f32 %v381_v0, %v656_v1  ;;  %v658_v4 = vld [vmem:[%s256_s5 + $0x28] sm:$0xff]  ;;  %v657_v6 = vld [vmem:[%s256_s5 + $0x20] sm:$0xff]  ;;  %v302_v19 = vand.u32 2147483647, %v301_v17  ;;  %v653_v40 = vld [vmem:[%s1139_s10 + $0x40] sm:$0xff] }
  0x7d   : > { %v382_v5 = vld [vmem:[%s256_s5 + $0x8] sm:$0xff]  ;;  %v390_v7 = vsub.f32 %v383_v2, %v658_v4  ;;  %v311_v36 = vld [vmem:[%s1227_s3] sm:$0x7]  ;;  %v655_v45 = vld [vmem:[%s1139_s10 + $0x48] sm:$0xff]  ;;  %s512_s5 = scalar_lea.sflag [#allocation4], %s1135_s20 }
  0x7e   : > { %v389_v8 = vsub.f32 %v382_v5, %v657_v6  ;;  %v391_v9 = vmul.f32 %v388_v3, %v388_v3  ;;  %v303_v20 = vadd.f32 %v302_v19, %v296_v18  ;;  %v650_v37 = vld [vmem:[%s1139_s10 + $0x10] sm:$0xff]  ;;  %v652_v39 = vld [vmem:[%s1139_s10 + $0x18] sm:$0xff]  ;;  %v654_v44 = vld [vmem:[%s1139_s10 + $0x20] sm:$0xff]  ;;  %s290_s10 = scalar_lea.vmem [#allocation8], %s645_s7 }
  0x7f   : > { %v393_v10 = vmul.f32 %v390_v7, %v390_v7  ;;  %v355_v42 = vsub.f32 %v650_v37, %v651_v38  ;;  %v361_v43 = vsub.f32 %v652_v39, %v653_v40  ;;  %v368_v49 = vsub.f32 %v654_v44, %v655_v45  ;;  %s525_s30 = sshll.u32 %s290_s10, 4  ;;  %s1183_s30 = int_to_ptr.vmem [resolvable:$true] %s525_s30 }
  0x80   : > { %394 = vadd.xlane.f32.xlu0 %v391_v9  ;;  %v392_v11 = vmul.f32 %v389_v8, %v389_v8  ;;  %v304_v23 = vmul.f32 %v303_v20, %v291_v21  ;;  %s843_s19 = scalar_lea.vmem %s1183_s30, 128 }
  0x81   : > { %398 = vadd.xlane.f32.xlu1 %v393_v10  ;;  %v356_v47 = vand.u32 2147483647, %v355_v42  ;;  %v362_v48 = vand.u32 2147483647, %v361_v43  ;;  %v369_v53 = vand.u32 2147483647, %v368_v49  ;;  %p844_p12 = scmp.ne.s32.totalorder %s1183_s30, %s843_s19 }
  0x82   : > { %v305_v28 = vrot.slane %v304_v23, 4 }
  0x83   : > { %v363_v52 = vadd.f32 %v362_v48, %v356_v47  ;;  %p845_p7 = pnand %p844_p12, %p1253_p4 }
  0x84   : > { %396 = vadd.xlane.f32.xlu0 %v392_v11  ;;  %v306_v31 = vadd.f32 %v305_v28, %v304_v23 }
  0x85   : > { %v370_v55 = vadd.f32 %v369_v53, %v363_v52  ;;  %p846_p8 = pneg %p845_p7 }
  0x86   : > { %v307_v32 = vrot.slane %v306_v31, 2 }
  0x87   : > { %v371_v58 = vmul.f32 %v649_v57, %v370_v55 }
  0x88   : > { %v308_v33 = vadd.f32 %v307_v32, %v306_v31 }
  0x8a   : > { %v309_v34 = vrot.slane %v308_v33, 1 }
  0x8c   : > { %v310_v35 = vadd.f32 %v309_v34, %v308_v33 }
  0x8e   : > { %v312_v41 = vmul.f32 %v311_v36, %v310_v35 }
  0x90   : > { %v325_v46 = vrot.slane %v312_v41, 1  ;;  %v337_v51 = vrot.slane %v312_v41, 2  ;;  %v314_v56 = vsel %vm313_vm0, %v312_v41, 0.0 }
  0x92   : > { %v327_v50 = vsel %vm313_vm0, %v325_v46, 0.0  ;;  %v339_v54 = vsel %vm313_vm0, %v337_v51, 0.0 }
 0x10d   : > { %v395_v24 = vpop.xlane.xlu0 %394 }
 0x10e   : > { %v402_v25 = vmul.f32 %v659_v22, %v395_v24  ;;  %v399_v26 = vpop.xlane.xlu1 %398 }
 0x10f   : > { %v453_v27 = vmul.f32 %v659_v22, %v399_v26 }
 0x110   : > { %415 = vrot.lane.b32.xlu1 %v402_v25, %s923_s25  ;;  %v404_v59 = vsel %vm403_vm1, %v402_v25, 0.0 }
 0x111   : > { %v397_v29 = vpop.xlane.xlu0 %396  ;;  %v454_v61 = vsel %vm403_vm1, %v453_v27, 0.0 }
 0x112   : > { %v428_v30 = vmul.f32 %v659_v22, %v397_v29 }
 0x114   : > { %465 = vrot.lane.b32.xlu1 %v453_v27, %s923_s25  ;;  %440 = vrot.lane.b32.xlu0 %v428_v30, %s923_s25  ;;  %v429_v60 = vsel %vm403_vm1, %v428_v30, 0.0  ;;  %s924_s25 = smov [#allocation8]  }
 0x115   : > { %s847_s8 = sshll.u32 %s924_s25, 4  ;;  %s848_s8 = int_to_ptr.vmem [resolvable:$false] %s847_s8 }
 0x116   : > { %s849_s1 = scalar_lea.vmem %s848_s8, 256  ;;  %p850_p6 = scmp.lt.s32.totalorder %s1183_s30, %s848_s8 }
 0x117   : > { %p851_p10 = scmp.lt.s32.totalorder %s849_s1, %s843_s19 }
 0x119   : > { %p852_p1 = por %p851_p10, %p850_p6 }
 0x11b   : > { %p853_p5 = pnand %p852_p1, %p846_p8 }
 0x133   : > { %328 = vadd.xlane.f32.xlu0 %v327_v50 }
 0x137   : > { %340 = vadd.xlane.f32.xlu0 %v339_v54 }
 0x138   : > { %315 = vadd.xlane.f32.xlu1 %v314_v56 }
 0x13b   : > { %405 = vadd.xlane.f32.xlu0 %v404_v59 }
 0x13c   : > { %372 = vadd.xlane.f32.xlu1 %v371_v58 }
 0x13f   : > { %430 = vadd.xlane.f32.xlu0 %v429_v60 }
 0x143   : > { %455 = vadd.xlane.f32.xlu0 %v454_v61 }
 0x182   : > { %v416_v62 = vpop.permute.xlu1 %415 }
 0x183   : > { %v418_v63 = vsel %vm403_vm1, %v416_v62, 0.0 }
 0x184   : > { %419 = vadd.xlane.f32.xlu1 %v418_v63 }
 0x186   : > { %v441_v0 = vpop.permute.xlu0 %440  ;;  %v466_v1 = vpop.permute.xlu1 %465 }
 0x187   : > { %v443_v2 = vsel %vm403_vm1, %v441_v0, 0.0  ;;  %v468_v3 = vsel %vm403_vm1, %v466_v1, 0.0 }
 0x188   : > { %444 = vadd.xlane.f32.xlu1 %v443_v2 }
 0x18c   : > { %469 = vadd.xlane.f32.xlu1 %v468_v3 }
 0x1c0   : > { %v329_v4 = vpop.xlane.xlu0 %328 }
 0x1c1   : > { %v330_v5 = vrot.slane %v329_v4, 4 }
 0x1c3   : > { %v331_v6 = vadd.f32 %v330_v5, %v329_v4 }
 0x1c4   : > { %v341_v7 = vpop.xlane.xlu0 %340 }
 0x1c5   : > { %v332_v8 = vrot.slane %v331_v6, 2  ;;  %v342_v9 = vrot.slane %v341_v7, 4  ;;  %v316_v10 = vpop.xlane.xlu1 %315 }
 0x1c6   : > { %v317_v11 = vrot.slane %v316_v10, 4 }
 0x1c7   : > { %v343_v12 = vadd.f32 %v342_v9, %v341_v7  ;;  %v333_v13 = vadd.f32 %v332_v8, %v331_v6 }
 0x1c8   : > { %v318_v14 = vadd.f32 %v317_v11, %v316_v10  ;;  %v406_v15 = vpop.xlane.xlu0 %405  ;;  %v478_v10 = vlaneseq }
 0x1c9   : > { %v344_v16 = vrot.slane %v343_v12, 2  ;;  %v407_v17 = vrot.slane %v406_v15, 4  ;;  %v373_v18 = vpop.xlane.xlu1 %372  ;;  %v334_v22 = vrot.slane %v333_v13, 1 }
 0x1ca   : > { %v319_v19 = vrot.slane %v318_v14, 2  ;;  %v374_v20 = vrot.slane %v373_v18, 4  ;;  %v479_v11 = vand.u32 127, %v478_v10 }
 0x1cb   : > { %v408_v21 = vadd.f32 %v407_v17, %v406_v15  ;;  %v345_v23 = vadd.f32 %v344_v16, %v343_v12  ;;  %v335_v30 = vadd.f32 %v334_v22, %v333_v13 }
 0x1cc   : > { %v375_v24 = vadd.f32 %v374_v20, %v373_v18  ;;  %v320_v25 = vadd.f32 %v319_v19, %v318_v14  ;;  %v431_v39 = vpop.xlane.xlu0 %430  ;;  %vm480_vm2 = vcmp.eq.s32.totalorder %v479_v11, 0  ;;  %vm483_vm3 = vcmp.eq.s32.totalorder %v479_v11, 1 }
 0x1cd   : > { %v409_v26 = vrot.slane %v408_v21, 2  ;;  %v346_v27 = vrot.slane %v345_v23, 1  ;;  %v432_v40 = vrot.slane %v431_v39, 4  ;;  %vm486_vm4 = vcmp.eq.s32.totalorder %v479_v11, 2 }
 0x1ce   : > { %v376_v28 = vrot.slane %v375_v24, 2  ;;  %v321_v29 = vrot.slane %v320_v25, 1  ;;  %vm489_vm5 = vcmp.eq.s32.totalorder %v479_v11, 3  ;;  %vm492_vm6 = vcmp.eq.s32.totalorder %v479_v11, 4 }
 0x1cf   : > { %v410_v31 = vadd.f32 %v409_v26, %v408_v21  ;;  %v347_v33 = vadd.f32 %v346_v27, %v345_v23  ;;  %v433_v42 = vadd.f32 %v432_v40, %v431_v39  ;;  %vm495_vm7 = vcmp.eq.s32.totalorder %v479_v11, 5 }
 0x1d0   : > { %v322_v32 = vadd.f32 %v321_v29, %v320_v25  ;;  %v377_v34 = vadd.f32 %v376_v28, %v375_v24  ;;  %v456_v41 = vpop.xlane.xlu0 %455  ;;  %vm498_vm8 = vcmp.eq.s32.totalorder %v479_v11, 6  ;;  %vm501_vm9 = vcmp.eq.s32.totalorder %v479_v11, 7 }
 0x1d1   : > { %v411_v35 = vrot.slane %v410_v31, 1  ;;  %v457_v43 = vrot.slane %v456_v41, 4  ;;  %v434_v44 = vrot.slane %v433_v42, 2  ;;  %vm504_vm10 = vcmp.eq.s32.totalorder %v479_v11, 8 }
 0x1d2   : > { %671 = vpush %v322_v32  ;;  %v378_v36 = vrot.slane %v377_v34, 1  ;;  %vm507_vm11 = vcmp.eq.s32.totalorder %v479_v11, 9 }
 0x1d3   : > { %673 = vpush %v335_v30  ;;  %v412_v37 = vadd.f32 %v411_v35, %v410_v31  ;;  %v458_v45 = vadd.f32 %v457_v43, %v456_v41  ;;  %v435_v51 = vadd.f32 %v434_v44, %v433_v42 }
 0x1d4   : > { %675 = vpush %v347_v33  ;;  %v379_v38 = vadd.f32 %v378_v36, %v377_v34 }
 0x1d5   : > { %v459_v49 = vrot.slane %v458_v45, 2  ;;  %v436_v58 = vrot.slane %v435_v51, 1 }
 0x1d6   : > { %677 = vpush %v379_v38 }
 0x1d7   : > { %679 = vpush %v412_v37  ;;  %v460_v56 = vadd.f32 %v459_v49, %v458_v45  ;;  %v437_v1 = vadd.f32 %v436_v58, %v435_v51 }
 0x1d9   : > { %v461_v2 = vrot.slane %v460_v56, 1 }
 0x1db   : > { %v462_v7 = vadd.f32 %v461_v2, %v460_v56 }
 0x203   : > { %s672_s21 = spop %671 }
 0x204   : > { %v481_v12 = vstv %s672_s21  ;;  %s674_s24 = spop %673 }
 0x205   : > { %v482_v13 = vsel %vm480_vm2, %v481_v12, 0.0  ;;  %v484_v14 = vstv %s674_s24  ;;  %s676_s27 = spop %675 }
 0x206   : > { %v485_v15 = vsel %vm483_vm3, %v484_v14, %v482_v13  ;;  %v487_v16 = vstv %s676_s27 }
 0x207   : > { %s678_s17 = spop %677  ;;  %v488_v17 = vsel %vm486_vm4, %v487_v16, %v485_v15 }
 0x208   : > { %v490_v18 = vstv %s678_s17  ;;  %s680_s28 = spop %679 }
 0x209   : > { %v491_v19 = vsel %vm489_vm5, %v490_v18, %v488_v17  ;;  %v493_v20 = vstv %s680_s28 }
 0x20a   : > { %v494_v21 = vsel %vm492_vm6, %v493_v20, %v491_v19 }
 0x211   : > { %v420_v46 = vpop.xlane.xlu1 %419 }
 0x212   : > { %v421_v47 = vrot.slane %v420_v46, 4 }
 0x214   : > { %v422_v48 = vadd.f32 %v421_v47, %v420_v46 }
 0x215   : > { %v445_v50 = vpop.xlane.xlu1 %444 }
 0x216   : > { %v423_v52 = vrot.slane %v422_v48, 2  ;;  %v446_v53 = vrot.slane %v445_v50, 4 }
 0x218   : > { %v447_v54 = vadd.f32 %v446_v53, %v445_v50  ;;  %v424_v55 = vadd.f32 %v423_v52, %v422_v48 }
 0x219   : > { %v470_v57 = vpop.xlane.xlu1 %469 }
 0x21a   : > { %v448_v59 = vrot.slane %v447_v54, 2  ;;  %v471_v60 = vrot.slane %v470_v57, 4  ;;  %v425_v61 = vrot.slane %v424_v55, 1 }
 0x21c   : > { %v472_v62 = vadd.f32 %v471_v60, %v470_v57  ;;  %v426_v63 = vadd.f32 %v425_v61, %v424_v55  ;;  %v449_v0 = vadd.f32 %v448_v59, %v447_v54 }
 0x21e   : > { %v473_v3 = vrot.slane %v472_v62, 2  ;;  %681 = vpush %v426_v63  ;;  %v450_v4 = vrot.slane %v449_v0, 1 }
 0x21f   : > { %683 = vpush %v437_v1 }
 0x220   : > { %v474_v5 = vadd.f32 %v473_v3, %v472_v62  ;;  %v451_v6 = vadd.f32 %v450_v4, %v449_v0 }
 0x222   : > { %685 = vpush %v451_v6  ;;  %v475_v8 = vrot.slane %v474_v5, 1 }
 0x223   : > { %687 = vpush %v462_v7 }
 0x224   : > { %v476_v9 = vadd.f32 %v475_v8, %v474_v5 }
 0x226   : > { %689 = vpush %v476_v9 }
 0x24f   : > { %s682_s6 = spop %681 }
 0x250   : > { %v496_v22 = vstv %s682_s6  ;;  %s684_s22 = spop %683 }
 0x251   : > { %v497_v23 = vsel %vm495_vm7, %v496_v22, %v494_v21  ;;  %v499_v24 = vstv %s684_s22 }
 0x252   : > { %v500_v25 = vsel %vm498_vm8, %v499_v24, %v497_v23 }
 0x253   : > { %s686_s11 = spop %685 }
 0x254   : > { %v502_v26 = vstv %s686_s11  ;;  %s688_s23 = spop %687 }
 0x255   : > { %v503_v27 = vsel %vm501_vm9, %v502_v26, %v500_v25  ;;  %v505_v28 = vstv %s688_s23 }
 0x256   : > { %v506_v29 = vsel %vm504_vm10, %v505_v28, %v503_v27 }
 0x257   : > { %s690_s12 = spop %689 }
 0x258   : > { %v508_v30 = vstv %s690_s12 }
 0x259   : > { %v509_v31 = vsel %vm507_vm11, %v508_v30, %v506_v29 }
 0x25a   : > { %510 = vst [vmem:[%s290_s10] sm:$0xff] %v509_v31 }
 0x25b   : > { %856 = shalt.err (!%p853_p5)
}
 0x25c   : > { %s857_s20 = scalar_lea.hbm %s1181_s14, 128  ;;  %s861_s27 = scalar_lea.hbm %s1228_s4, 384 }
 0x25d   : > { %p858_p11 = scmp.ne.s32.totalorder %s1181_s14, %s857_s20  ;;  %p862_p2 = scmp.lt.u32.totalorder %s1181_s14, %s1228_s4 }
 0x25e   : > { %p863_p3 = scmp.lt.u32.totalorder %s861_s27, %s857_s20  ;;  %p865_p12 = scmp.lt.u32.totalorder %s857_s20, %s1181_s14 }
 0x25f   : > { %p859_p9 = pnand %p858_p11, %p1253_p4 }
 0x260   : > { %p864_p13 = por %p863_p3, %p862_p2 }
 0x261   : > { %p860_p0 = pneg %p859_p9 }
 0x262   : > { %p866_p7 = por %p865_p12, %p864_p13 }
 0x264   : > { %p867_p8 = pnand %p866_p7, %p860_p0 }
 0x266   : > { %870 = shalt.err (!%p867_p8)
}
 0x267   : > { %697 = dma.vmem_to_hbm [thread:$0]  (%p1253_p4), %s1183_s30, 128, %s1181_s14, %s512_s5  }
 0x268 PF: > { %s1254_s6 = sld [smem:[#allocation15_spill]]  ;;  %p714_p6 = scmp.ge.s32.totalorder %s913_s18, 2 }
 0x269   : > { %s537_s7 = sand.u32 1, %s901_s15  }
 0x26a   : > { %s538_s22 = scalar_lea.sflag [#allocation4], %s537_s7 }
 0x26e   : > { %p1255_p10 = scmp.ne.s32.totalorder %s1254_s6, 0 }
 0x270   : > { %p710_p1 = pnand %p714_p6, %p1255_p10 }
 0x272   : > { %896 = dma.done.wait (!%p710_p1), %s538_s22, 128  }
 0x273   : > { %898 = vsyncadd (!%p710_p1), %s538_s22, 4294967168  ;;  %s1256_s18 = sld [smem:[#allocation13_spill]]  ;;  %s1257_s11 = sld [smem:[#allocation12_spill]] }
 0x274   : > { %s1258_s17 = sld [smem:[#allocation14_spill]]  ;;  %s1259_s15 = smov %s905_s16 }
 0x279   : > { %p20_p5 = scmp.ge.s32.totalorder %s1256_s18, 5   ;;  %s1260_s16 = smov %s1257_s11 }
 0x27b   :  { %22 = sbr.rel (!%p20_p5) target bundleno = 9 (0x9), region = 117 }
 0x282   :  { %543 = vsyncpa [#allocation3], 1 }
 0x283   :  { %545 = vsyncpa [#allocation3 + $0x1], 1 }
 0x284   :  { %546 = vsyncpa [#allocation6], 1 }
 0x285   :  { %548 = vsyncpa [#allocation6 + $0x1], 1 }
 0x286   :  { %549 = vsyncpa [#allocation4], 1 }
 0x287   :  { %551 = vsyncpa [#allocation4 + $0x1], 1 }

</bundles_post_ra>
